<compile_context>
chip_gen: v7x
topology: tpu7x:2x2x1
jax: 0.10.0
libtpu: 0.0.40
codegen_flags: <defaults>
</compile_context>

<pallas_src>
import math

import jax
import jax.numpy as jnp
from jax import lax
from jax.experimental import pallas as pl
from jax.experimental.pallas import tpu as pltpu


def _attention_kernel(q_ref, k_ref, v_ref, out_ref, attn_ref):
    # Blocks are (TB, C, N) for q/k/v/out and (TB, N, N) for attn.
    q = q_ref[...]  # (TB, C, N)
    k = k_ref[...]  # (TB, C, N)
    v = v_ref[...]  # (TB, C, N)

    d_k = q.shape[-1]  # static: N (matches query.size(-1) in PyTorch)
    scale = jnp.float32(1.0 / math.sqrt(d_k))

    # Fold the scale into q: C*N VPU multiplies instead of N^2 on the scores.
    q = q * scale

    # scores[b, i, j] = sum_c q[b, c, i] * k[b, c, j]   -> (TB, N, N)
    # Contract over the channel dim; batch over dim 0.  No transposes needed.
    scores = lax.dot_general(
        q, k,
        dimension_numbers=(((1,), (1,)), ((0,), (0,))),
        preferred_element_type=jnp.float32,
    )

    # Numerically stable softmax over the last dim.
    m = jnp.max(scores, axis=-1, keepdims=True)
    e = jnp.exp(scores - m)
    denom = jnp.sum(e, axis=-1, keepdims=True)
    # One reciprocal per row on the EUP instead of N^2 divides on the VPU.
    p_attn = e * pl.reciprocal(denom, approx=True)

    attn_ref[...] = p_attn.astype(attn_ref.dtype)

    # out[b, c, i] = sum_j v[b, c, j] * p_attn[b, i, j] -> (TB, C, N)
    # Produces the PyTorch-returned (C, N) orientation directly (no final .T).
    out = lax.dot_general(
        v, p_attn,
        dimension_numbers=(((2,), (2,)), ((0,), (0,))),
        preferred_element_type=jnp.float32,
    )
    out_ref[...] = out.astype(out_ref.dtype)


def _pick_batch_block(B, C, N, itemsize=4):
    """Largest batch tile TB (divisor of B) whose double-buffered blocks stay
    comfortably under the smallest default scoped-VMEM budget (v5e: 16 MiB)."""
    # Per-batch-element block bytes: q + k + v + out (C*N each) + attn (N*N).
    bytes_per_batch = (4 * C * N + N * N) * itemsize
    budget = 6 * 1024 * 1024  # leave ample headroom below 16 MiB after 2x buffering
    tb = max(1, budget // (2 * bytes_per_batch))
    tb = min(tb, B)
    while B % tb:
        tb -= 1
    return tb


def attention(query, key, value, mask=False):
    """Pallas equivalent of Attention.forward (eval mode).

    query/key/value: (B, C, N).
    Returns (out (B, C, N), p_attn (B, N, N)).
    """
    # TODO(synk): `mask=True` applies nn.Dropout(0.1) to p_attn in training
    # mode; in eval mode dropout is the identity, which is what we implement.
    del mask

    B, C, N = query.shape
    assert key.shape == (B, C, N) and value.shape == (B, C, N)

    tb = _pick_batch_block(B, C, N)

    grid_spec = pltpu.PrefetchScalarGridSpec(
        num_scalar_prefetch=0,
        grid=(B // tb,),
        in_specs=[
            pl.BlockSpec((tb, C, N), lambda b: (b, 0, 0)),
            pl.BlockSpec((tb, C, N), lambda b: (b, 0, 0)),
            pl.BlockSpec((tb, C, N), lambda b: (b, 0, 0)),
        ],
        out_specs=[
            pl.BlockSpec((tb, C, N), lambda b: (b, 0, 0)),
            pl.BlockSpec((tb, N, N), lambda b: (b, 0, 0)),
        ],
    )

    out, p_attn = pl.pallas_call(
        _attention_kernel,
        out_shape=(
            jax.ShapeDtypeStruct((B, C, N), query.dtype),
            jax.ShapeDtypeStruct((B, N, N), query.dtype),
        ),
        grid_spec=grid_spec,
        compiler_params=pltpu.CompilerParams(
            dimension_semantics=("parallel",)
        ),
    )(query, key, value)
    return out, p_attn


def _reference(query, key, value):
    d_k = query.shape[-1]
    scores = jnp.einsum("bcn,bcm->bnm", query, key) / math.sqrt(d_k)
    p = jax.nn.softmax(scores, axis=-1)
    out = jnp.einsum("bnm,bcm->bnc", p, value)
    return jnp.swapaxes(out, -2, -1), p


if __name__ == "__main__":
    key0 = jax.random.PRNGKey(0)
    kq, kk, kv = jax.random.split(key0, 3)

    B, C, N = 2, 4, 16  # small shapes consistent with conv1d-output attention
    query = jax.random.normal(kq, (B, C, N), dtype=jnp.float32)
    key = jax.random.normal(kk, (B, C, N), dtype=jnp.float32)
    value = jax.random.normal(kv, (B, C, N), dtype=jnp.float32)

    out, p_attn = attention(query, key, value, mask=False)
    jax.block_until_ready((out, p_attn))

    ref_out, ref_attn = _reference(query, key, value)
    assert out.shape == (B, C, N) and p_attn.shape == (B, N, N)
    # Tolerance accounts for the approx (EUP) reciprocal in the softmax.
    assert jnp.allclose(out, ref_out, atol=5e-3, rtol=5e-3)
    assert jnp.allclose(p_attn, ref_attn, atol=5e-3, rtol=5e-3)
    # Softmax rows should still sum to ~1.
    assert jnp.allclose(jnp.sum(p_attn, axis=-1), 1.0, atol=5e-3)

    print("KERNEL_OK")
</pallas_src>

<mosaic_0001>
module attributes {stable_mosaic.version = 11 : i64} {
  func.func @_attention_kernel(%arg0: i32, %arg1: memref<2x4x16xf32, #tpu.memory_space<vmem>>, %arg2: memref<2x4x16xf32, #tpu.memory_space<vmem>>, %arg3: memref<2x4x16xf32, #tpu.memory_space<vmem>>, %arg4: memref<2x4x16xf32, #tpu.memory_space<vmem>>, %arg5: memref<2x16x16xf32, #tpu.memory_space<vmem>>) attributes {dimension_semantics = [#tpu.dimension_semantics<parallel>], iteration_bounds = array<i64: 1>, scalar_prefetch = 0 : i64, scratch_operands = 0 : i64, tpu.core_type = #tpu.core_type<tc>, window_params = [{transform_indices = @transform_0, window_bounds = array<i64: 2, 4, 16>}, {transform_indices = @transform_1, window_bounds = array<i64: 2, 4, 16>}, {transform_indices = @transform_2, window_bounds = array<i64: 2, 4, 16>}, {transform_indices = @transform_3, window_bounds = array<i64: 2, 4, 16>}, {transform_indices = @transform_4, window_bounds = array<i64: 2, 16, 16>}]} {
    %c0 = arith.constant 0 : index
    %c0_0 = arith.constant 0 : index
    %c0_1 = arith.constant 0 : index
    %0 = vector.load %arg1[%c0, %c0_0, %c0_1] : memref<2x4x16xf32, #tpu.memory_space<vmem>>, vector<2x4x16xf32>
    %c0_2 = arith.constant 0 : index
    %c0_3 = arith.constant 0 : index
    %c0_4 = arith.constant 0 : index
    %1 = vector.load %arg2[%c0_2, %c0_3, %c0_4] : memref<2x4x16xf32, #tpu.memory_space<vmem>>, vector<2x4x16xf32>
    %c0_5 = arith.constant 0 : index
    %c0_6 = arith.constant 0 : index
    %c0_7 = arith.constant 0 : index
    %2 = vector.load %arg3[%c0_5, %c0_6, %c0_7] : memref<2x4x16xf32, #tpu.memory_space<vmem>>, vector<2x4x16xf32>
    %cst = arith.constant 2.500000e-01 : f32
    %3 = vector.broadcast %cst : f32 to vector<2x4x16xf32>
    %4 = arith.mulf %0, %3 : vector<2x4x16xf32>
    %cst_8 = arith.constant dense<0.000000e+00> : vector<2x16x16xf32>
    %5 = tpu.matmul %4, %1, %cst_8 {dimension_numbers = #tpu.dot_dimension_numbers<[1], [1], [2], [2], [0, 0, 0, 2, 1, 2], [0], [0]>} : vector<2x4x16xf32>, vector<2x4x16xf32>, vector<2x16x16xf32> -> vector<2x16x16xf32>
    %cst_9 = arith.constant dense<0xFF800000> : vector<2x16xf32>
    %6 = vector.multi_reduction <maximumf>, %5, %cst_9 [2] : vector<2x16x16xf32> to vector<2x16xf32>
    %7 = vector.shape_cast %6 : vector<2x16xf32> to vector<2x16x1xf32>
    %8 = vector.broadcast %7 : vector<2x16x1xf32> to vector<2x16x16xf32>
    %9 = arith.subf %5, %8 : vector<2x16x16xf32>
    %10 = math.exp %9 : vector<2x16x16xf32>
    %cst_10 = arith.constant dense<0.000000e+00> : vector<2x16xf32>
    %11 = vector.multi_reduction <add>, %10, %cst_10 [2] : vector<2x16x16xf32> to vector<2x16xf32>
    %12 = vector.shape_cast %11 : vector<2x16xf32> to vector<2x16x1xf32>
    %13 = tpu.reciprocal %12 {approx = true} : vector<2x16x1xf32> -> vector<2x16x1xf32>
    %14 = vector.broadcast %13 : vector<2x16x1xf32> to vector<2x16x16xf32>
    %15 = arith.mulf %10, %14 : vector<2x16x16xf32>
    %c0_11 = arith.constant 0 : index
    %c0_12 = arith.constant 0 : index
    %c0_13 = arith.constant 0 : index
    %16 = vector.load %arg5[%c0_11, %c0_12, %c0_13] : memref<2x16x16xf32, #tpu.memory_space<vmem>>, vector<2x16x16xf32>
    tpu.vector_store %arg5[%c0_11, %c0_12, %c0_13], %15 {strides = array<i32>} : memref<2x16x16xf32, #tpu.memory_space<vmem>>, vector<2x16x16xf32>,
    %cst_14 = arith.constant dense<0.000000e+00> : vector<2x4x16xf32>
    %17 = tpu.matmul %2, %15, %cst_14 {dimension_numbers = #tpu.dot_dimension_numbers<[2], [2], [1], [1], [0, 0, 0, 1, 1, 1], [0], [0]>} : vector<2x4x16xf32>, vector<2x16x16xf32>, vector<2x4x16xf32> -> vector<2x4x16xf32>
    %c0_15 = arith.constant 0 : index
    %c0_16 = arith.constant 0 : index
    %c0_17 = arith.constant 0 : index
    %18 = vector.load %arg4[%c0_15, %c0_16, %c0_17] : memref<2x4x16xf32, #tpu.memory_space<vmem>>, vector<2x4x16xf32>
    tpu.vector_store %arg4[%c0_15, %c0_16, %c0_17], %17 {strides = array<i32>} : memref<2x4x16xf32, #tpu.memory_space<vmem>>, vector<2x4x16xf32>,
    return
  }
  func.func @transform_0(%arg0: i32) -> (i32, i32, i32) {
    %c0_i32 = arith.constant 0 : i32
    %c0_i32_0 = arith.constant 0 : i32
    %c0_i32_1 = arith.constant 0 : i32
    return %arg0, %c0_i32, %c0_i32_0 : i32, i32, i32
  }
  func.func @transform_1(%arg0: i32) -> (i32, i32, i32) {
    %c0_i32 = arith.constant 0 : i32
    %c0_i32_0 = arith.constant 0 : i32
    %c0_i32_1 = arith.constant 0 : i32
    return %arg0, %c0_i32, %c0_i32_0 : i32, i32, i32
  }
  func.func @transform_2(%arg0: i32) -> (i32, i32, i32) {
    %c0_i32 = arith.constant 0 : i32
    %c0_i32_0 = arith.constant 0 : i32
    %c0_i32_1 = arith.constant 0 : i32
    return %arg0, %c0_i32, %c0_i32_0 : i32, i32, i32
  }
  func.func @transform_3(%arg0: i32) -> (i32, i32, i32) {
    %c0_i32 = arith.constant 0 : i32
    %c0_i32_0 = arith.constant 0 : i32
    %c0_i32_1 = arith.constant 0 : i32
    return %arg0, %c0_i32, %c0_i32_0 : i32, i32, i32
  }
  func.func @transform_4(%arg0: i32) -> (i32, i32, i32) {
    %c0_i32 = arith.constant 0 : i32
    %c0_i32_0 = arith.constant 0 : i32
    %c0_i32_1 = arith.constant 0 : i32
    return %arg0, %c0_i32, %c0_i32_0 : i32, i32, i32
  }
}

</mosaic_0001>

<bundles_post_ra>
// kernel: tpu_custom_call.1
= control target key start
LH: loop header
LB: loop body
LE: loop exit
PB: predicated region body
PF: predicated region fallthrough
CT: control target
= control target key end

     0   :  { %10 = vsyncpa [#allocation3], 0  ;;  %s879_s0 = inlined_call_operand.hbm [shape: f32[2,4,16], index: 0, kind: input, shape index: {}]   ;;  %s880_s1 = inlined_call_operand.hbm [shape: f32[2,4,16], index: 1, kind: input, shape index: {}]   ;;  %s881_s2 = inlined_call_operand.hbm [shape: f32[2,4,16], index: 2, kind: input, shape index: {}]   ;;  %s882_s3 = inlined_call_operand.hbm [shape: f32[2,4,16], index: 3, kind: output, shape index: {0}]   ;;  %s883_s4 = inlined_call_operand.hbm [shape: f32[2,16,16], index: 4, kind: output, shape index: {1}]  }
   0x1   :  { %11 = vsyncpa [#allocation6], 0 }
   0x2   :  { %12 = vsyncpa [#allocation4], 0 }
   0x3   :  { %13 = vsyncpa [#allocation10], 0  ;;  %s747_s15 = smov [#allocation5]   ;;  %s748_s17 = smov [#allocation2]  }
   0x4   :  { %s31_s16 = sshll.u32 %s747_s15, 4  ;;  %s19_s18 = sshll.u32 %s748_s17, 4  ;;  %s32_s16 = int_to_ptr.vmem [resolvable:$true] %s31_s16  ;;  %s784_s18 = int_to_ptr.vmem [resolvable:$true] %s19_s18 }
   0x5   :  { %s629_s21 = scalar_lea.hbm %s880_s1, 128 }
   0x6   :  { %p630_p0 = scmp.ne.s32.totalorder %s880_s1, %s629_s21  ;;  %p633_p1 = scmp.lt.u32.totalorder %s629_s21, %s880_s1 }
   0x8   :  { %p635_p2 = pnand %p633_p1, %p630_p0 }
   0xa   :  { %638 = shalt.err (!%p635_p2)
}
   0xb   :  { %s639_s26 = scalar_lea.vmem %s32_s16, 128  ;;  %p644_p4 = scmp.lt.s32.totalorder %s32_s16, %s32_s16 }
   0xc   :  { %p640_p3 = scmp.ne.s32.totalorder %s32_s16, %s639_s26  ;;  %p645_p5 = scmp.lt.s32.totalorder %s639_s26, %s639_s26 }
   0xe   :  { %p646_p6 = por %p645_p5, %p644_p4 }
  0x10   :  { %p647_p7 = pnand %p646_p6, %p640_p3 }
  0x12   :  { %650 = shalt.err (!%p647_p7)
}
  0x13   :  { %s749_s27 = smov 64   ;;  %s750_s28 = smov 4  }
  0x14   :  { %37 = dma.hbm_to_vmem [thread:$0]  %s880_s1, 128, %s32_s16, [#allocation6], %s749_s27, %s749_s27, %s750_s28  }
  0x15   :  { %s651_s7 = scalar_lea.hbm %s879_s0, 128 }
  0x16   :  { %p652_p8 = scmp.ne.s32.totalorder %s879_s0, %s651_s7  ;;  %p655_p9 = scmp.lt.u32.totalorder %s651_s7, %s879_s0 }
  0x18   :  { %p657_p10 = pnand %p655_p9, %p652_p8 }
  0x1a   :  { %660 = shalt.err (!%p657_p10)
}
  0x1b   :  { %s661_s12 = scalar_lea.vmem %s784_s18, 128  ;;  %p666_p12 = scmp.lt.s32.totalorder %s784_s18, %s784_s18 }
  0x1c   :  { %p662_p11 = scmp.ne.s32.totalorder %s784_s18, %s661_s12  ;;  %p667_p13 = scmp.lt.s32.totalorder %s661_s12, %s661_s12 }
  0x1e   :  { %p668_p0 = por %p667_p13, %p666_p12 }
  0x20   :  { %p669_p1 = pnand %p668_p0, %p662_p11 }
  0x22   :  { %672 = shalt.err (!%p669_p1)
}
  0x23   :  { %25 = dma.hbm_to_vmem [thread:$0]  %s879_s0, 128, %s784_s18, [#allocation3], %s749_s27, %s749_s27, %s750_s28  }
  0x24   :  { %s751_s14 = smov [#allocation7]   ;;  %s673_s19 = scalar_lea.hbm %s881_s2, 128 }
  0x25   :  { %s43_s15 = sshll.u32 %s751_s14, 4  ;;  %p674_p2 = scmp.ne.s32.totalorder %s881_s2, %s673_s19  ;;  %s44_s15 = int_to_ptr.vmem [resolvable:$true] %s43_s15 }
  0x26   :  { %p677_p3 = scmp.lt.u32.totalorder %s673_s19, %s881_s2 }
  0x28   :  { %p679_p4 = pnand %p677_p3, %p674_p2 }
  0x2a   :  { %682 = shalt.err (!%p679_p4)
}
  0x2b   :  { %s683_s24 = scalar_lea.vmem %s44_s15, 128  ;;  %p688_p6 = scmp.lt.s32.totalorder %s44_s15, %s44_s15 }
  0x2c   :  { %p684_p5 = scmp.ne.s32.totalorder %s44_s15, %s683_s24  ;;  %p689_p7 = scmp.lt.s32.totalorder %s683_s24, %s683_s24 }
  0x2e   :  { %p690_p8 = por %p689_p7, %p688_p6 }
  0x30   :  { %p691_p9 = pnand %p690_p8, %p684_p5 }
  0x32   :  { %694 = shalt.err (!%p691_p9)
}
  0x33   :  { %49 = dma.hbm_to_vmem [thread:$0]  %s881_s2, 128, %s44_s15, [#allocation6], %s749_s27, %s749_s27, %s750_s28  }
  0x34   :  { %739 = dma.done.wait [#allocation3], 128  }
  0x35   :  { %740 = vsyncadd [#allocation3], 4294967168 }
  0x36   :  { %741 = dma.done.wait [#allocation6], 256  }
  0x37   :  { %742 = vsyncadd [#allocation6], 4294967040  ;;  %v59_v0 = vld [vmem:[#allocation2] sm:$0xf]  ;;  %v60_v2 = vld [vmem:[#allocation2 + $0x4] sm:$0xf] }
  0x38   :  { %v65_v1 = vmul.f32 0.25, %v59_v0  ;;  %v66_v3 = vmul.f32 0.25, %v60_v2  ;;  %v61_v4 = vld [vmem:[#allocation5] sm:$0xf]  ;;  %vm106_vm0 = vcmask 1043456   ;;  %vm99_vm1 = vcmask 31744  }
  0x39   :  { %569 = vmatprep.subr.msk.mxu0 %vm106_vm0, %v61_v4  ;;  %v62_v5 = vld [vmem:[#allocation5 + $0x4] sm:$0xf]  ;;  %vm301_vm2 = vcmask 130048   ;;  %v752_v38 = vmov 0.0|0.0   ;;  %vm753_vm3 = vmmov 0   ;;  %v754_v39 = vmov 0.0  }
  0x3a   :  { %67 = vxpose.xlu0.b32.start.end [1/1] (short) (narrow) %v65_v1, 16  ;;  %570 = vmatpush3.msk.msra.mxu0 %vm106_vm0, %v61_v4  ;;  %vm595_vm4 = vmpackc.low %vm301_vm2, %vm301_vm2  ;;  %v63_v52 = vld [vmem:[#allocation7] sm:$0xf]  ;;  %v64_v55 = vld [vmem:[#allocation7 + $0x4] sm:$0xf]  ;;  %s755_s2 = smov [#allocation9]  }
  0x3b   :  { %574 = vmatprep.subr.msk.mxu1 %vm106_vm0, %v62_v5  ;;  %593 = vmatprep.subr.bf16.mxu0 %v752_v38  ;;  %s528_s25 = sshll.u32 %s755_s2, 4  ;;  %s529_s25 = int_to_ptr.vmem [resolvable:$true] %s528_s25 }
  0x3c   :  { %575 = vmatpush3.msk.msra.mxu1 %vm106_vm0, %v62_v5  ;;  %s695_s26 = scalar_lea.vmem %s529_s25, 512  ;;  %p700_p11 = scmp.lt.s32.totalorder %s529_s25, %s529_s25 }
  0x3d   :  { %597 = vmatprep.subr.bf16.mxu1 %v752_v38  ;;  %p696_p10 = scmp.ne.s32.totalorder %s529_s25, %s695_s26  ;;  %p701_p12 = scmp.lt.s32.totalorder %s695_s26, %s695_s26 }
  0x3f   :  { %185 = vxpose.xlu0.b32.start.end [1/1] (short) (narrow) %v66_v3, 16  ;;  %p702_p13 = por %p701_p12, %p700_p11 }
  0x41   :  { %p703_p0 = pnand %p702_p13, %p696_p10 }
  0xba   :  { %v83_v6 = vpop.trf.xlu0 }
  0xbb   :  { %571 = vmatprep.mubr.msk.f32.mxu0 %vm99_vm1, %v83_v6 }
  0xbe   :  { %v84_v7 = vpop.trf.xlu0 }
  0xbf   :  { %572 = vmatmul.mubr.msk.f32.vlgmr.msra.gmra.mrb[0].mxu0 %vm99_vm1, %v84_v7 }
  0xc0   :  { %583 = vmatprep.mubr.msk.f32.mxu0 %vm753_vm3, %v754_v39 }
  0xc2   :  { %v201_v8 = vpop.trf.xlu0 }
  0xc3   :  { %576 = vmatprep.mubr.msk.f32.mxu1 %vm99_vm1, %v201_v8 }
  0xc6   :  { %v202_v9 = vpop.trf.xlu0 }
  0xc7   :  { %577 = vmatmul.mubr.msk.f32.vlgmr.msra.gmra.mrb[0].mxu1 %vm99_vm1, %v202_v9 }
  0xc8   :  { %590 = vmatprep.mubr.msk.f32.mxu1 %vm753_vm3, %v754_v39 }
 0x192   :  { %v573_v10 = vpop.f32.mrb[0].mxu0 }
 0x193   :  { %v176_v11 = vpop.f32.mrb[1].mxu0  ;;  %v305_v12 = vsel %vm301_vm2, %v573_v10, -inf }
 0x194   :  { %306 = vmax.xlane.f32.xlu1 %v305_v12  ;;  %v302_v13 = vsel %vm301_vm2, %v176_v11, -inf }
 0x198   :  { %303 = vmax.xlane.f32.xlu1 %v302_v13 }
 0x19a   :  { %v578_v14 = vpop.f32.mrb[0].mxu1 }
 0x19b   :  { %v292_v15 = vpop.f32.mrb[1].mxu1  ;;  %v311_v16 = vsel %vm301_vm2, %v578_v14, -inf }
 0x19c   :  { %312 = vmax.xlane.f32.xlu0 %v311_v16  ;;  %v308_v17 = vsel %vm301_vm2, %v292_v15, -inf }
 0x19d   :  { %309 = vmax.xlane.f32.xlu1 %v308_v17 }
 0x221   :  { %v307_v18 = vpop.xlane.xlu1 %306 }
 0x222   :  { %v315_v19 = vsub.f32 %v573_v10, %v307_v18 }
 0x224   :  { %v320_v20 = vmul.f32 1.442695, %v315_v19 }
 0x225   :  { %v304_v21 = vpop.xlane.xlu1 %303 }
 0x226   :  { %613 = vpow2.f32 %v320_v20  ;;  %v314_v22 = vsub.f32 %v176_v11, %v304_v21 }
 0x228   :  { %v318_v23 = vmul.f32 1.442695, %v314_v22 }
 0x229   :  { %v313_v24 = vpop.xlane.xlu0 %312 }
 0x22a   :  { %615 = vpow2.f32 %v318_v23  ;;  %v317_v25 = vsub.f32 %v578_v14, %v313_v24  ;;  %v310_v26 = vpop.xlane.xlu1 %309 }
 0x22b   :  { %v316_v27 = vsub.f32 %v292_v15, %v310_v26 }
 0x22c   :  { %v324_v28 = vmul.f32 1.442695, %v317_v25 }
 0x22d   :  { %v322_v29 = vmul.f32 1.442695, %v316_v27 }
 0x22f   :  { %617 = vpow2.f32 %v322_v29 }
 0x230   :  { %v614_v30 = vpop.eup %613  ;;  %619 = vpow2.f32 %v324_v28 }
 0x231   :  { %v329_v31 = vsel %vm301_vm2, %v614_v30, 0.0 }
 0x232   :  { %330 = vadd.xlane.f32.xlu1 %v329_v31 }
 0x234   :  { %v616_v32 = vpop.eup %615 }
 0x235   :  { %v326_v33 = vsel %vm301_vm2, %v616_v32, 0.0 }
 0x236   :  { %327 = vadd.xlane.f32.xlu1 %v326_v33 }
 0x239   :  { %v618_v34 = vpop.eup %617 }
 0x23a   :  { %v332_v35 = vsel %vm301_vm2, %v618_v34, 0.0  ;;  %v620_v36 = vpop.eup %619 }
 0x23b   :  { %333 = vadd.xlane.f32.xlu1 %v332_v35  ;;  %v335_v37 = vsel %vm301_vm2, %v620_v36, 0.0 }
 0x23f   :  { %336 = vadd.xlane.f32.xlu1 %v335_v37 }
 0x2bf   :  { %v331_v40 = vpop.xlane.xlu1 %330 }
 0x2c0   :  { %621 = vrcp.f32 %v331_v40 }
 0x2c3   :  { %v328_v41 = vpop.xlane.xlu1 %327 }
 0x2c4   :  { %623 = vrcp.f32 %v328_v41 }
 0x2c8   :  { %v334_v42 = vpop.xlane.xlu1 %333 }
 0x2c9   :  { %625 = vrcp.f32 %v334_v42 }
 0x2ca   :  { %v622_v43 = vpop.eup %621 }
 0x2cb   :  { %v343_v44 = vmul.f32 %v622_v43, %v614_v30 }
 0x2cc   :  { %v337_v45 = vpop.xlane.xlu1 %336 }
 0x2cd   :  { %347 = vst.msk [vmem:[#allocation9 + $0x8] sm:$0xff] %vm301_vm2, %v343_v44  ;;  %627 = vrcp.f32 %v337_v45 }
 0x2ce   :  { %v624_v46 = vpop.eup %623 }
 0x2cf   :  { %v342_v47 = vmul.f32 %v624_v46, %v616_v32 }
 0x2d1   :  { %346 = vst.msk [vmem:[#allocation9] sm:$0xff] %vm301_vm2, %v342_v47  ;;  %v594_v48 = vpack.c.bf16 %v343_v44, %v342_v47 }
 0x2d3   :  { %v626_v49 = vpop.eup %625  ;;  %596 = vmatpush3.bf16.xpose.msk.msra.mxu0 %vm595_vm4, %v594_v48 }
 0x2d4   :  { %v344_v50 = vmul.f32 %v626_v49, %v618_v34 }
 0x2d6   :  { %348 = vst.msk [vmem:[#allocation9 + $0x10] sm:$0xff] %vm301_vm2, %v344_v50 }
 0x2d7   :  { %v628_v51 = vpop.eup %627 }
 0x2d8   :  { %v345_v53 = vmul.f32 %v628_v51, %v620_v36 }
 0x2da   :  { %349 = vst.msk [vmem:[#allocation9 + $0x18] sm:$0xff] %vm301_vm2, %v345_v53  ;;  %v598_v54 = vpack.c.bf16 %v345_v53, %v344_v50  ;;  %584 = vmatmul.mubr.msk.f32.vlgmr.msra.gmra.mrb[2].mxu0 %vm301_vm2, %v63_v52 }
 0x2dc   :  { %600 = vmatpush3.bf16.xpose.msk.msra.mxu1 %vm595_vm4, %v598_v54 }
 0x2e3   :  { %591 = vmatmul.mubr.msk.f32.vlgmr.msra.gmra.mrb[2].mxu1 %vm301_vm2, %v64_v55 }
 0x2e4   :  { %706 = shalt.err (!%p703_p0)
}
 0x2e5   :  { %s707_s5 = scalar_lea.hbm %s883_s4, 512 }
 0x2e6   :  { %p708_p1 = scmp.ne.s32.totalorder %s883_s4, %s707_s5  ;;  %p711_p2 = scmp.lt.u32.totalorder %s707_s5, %s883_s4 }
 0x2e8   :  { %p713_p3 = pnand %p711_p2, %p708_p1 }
 0x2ea   :  { %716 = shalt.err (!%p713_p3)
}
 0x2eb   :  { %s756_s10 = smov 128   ;;  %s757_s11 = smov 8   ;;  %vm508_vm5 = vcmask 125952  }
 0x2ec   :  { %534 = dma.vmem_to_hbm [thread:$0]  %s529_s25, 512, %s883_s4, [#allocation10], %s756_s10, %s756_s10, %s757_s11  }
 0x2ed   :  { %s758_s13 = smov [#allocation8]  }
 0x2ee   :  { %s516_s14 = sshll.u32 %s758_s13, 4  ;;  %s517_s14 = int_to_ptr.vmem [resolvable:$true] %s516_s14 }
 0x2ef   :  { %s717_s15 = scalar_lea.vmem %s517_s14, 128  ;;  %p722_p5 = scmp.lt.s32.totalorder %s517_s14, %s517_s14 }
 0x2f0   :  { %p718_p4 = scmp.ne.s32.totalorder %s517_s14, %s717_s15  ;;  %p723_p6 = scmp.lt.s32.totalorder %s717_s15, %s717_s15 }
 0x2f2   :  { %p724_p7 = por %p723_p6, %p722_p5 }
 0x2f4   :  { %p725_p8 = pnand %p724_p7, %p718_p4 }
 0x3ad   :  { %v425_v56 = vpop.f32.mrb[2].mxu0 }
 0x3ae   :  { %509 = vst.msk [vmem:[#allocation8] sm:$0xf] %vm508_vm5, %v425_v56  ;;  %v585_v57 = vpop.f32.mrb[3].mxu0 }
 0x3b6   :  { %v504_v58 = vpop.f32.mrb[2].mxu1 }
 0x3b7   :  { %510 = vst.msk [vmem:[#allocation8 + $0x4] sm:$0xf] %vm508_vm5, %v504_v58  ;;  %v592_v59 = vpop.f32.mrb[3].mxu1 }
 0x3b8   :  { %728 = shalt.err (!%p725_p8)
}
 0x3b9   :  { %s729_s4 = scalar_lea.hbm %s882_s3, 128 }
 0x3ba   :  { %p730_p9 = scmp.ne.s32.totalorder %s882_s3, %s729_s4  ;;  %p733_p10 = scmp.lt.u32.totalorder %s729_s4, %s882_s3 }
 0x3bc   :  { %p735_p11 = pnand %p733_p10, %p730_p9 }
 0x3be   :  { %738 = shalt.err (!%p735_p11)
}
 0x3bf   :  { %522 = dma.vmem_to_hbm [thread:$0]  %s517_s14, 128, %s882_s3, [#allocation4], %s749_s27, %s749_s27, %s750_s28  }
 0x3c0   :  { %743 = dma.done.wait [#allocation4], 128  }
 0x3c1   :  { %744 = vsyncadd [#allocation4], 4294967168 }
 0x3c2   :  { %745 = dma.done.wait [#allocation10], 512  }
 0x3c3   :  { %746 = vsyncadd [#allocation10], 4294966784 }
 0x3c4   :  { %541 = vsyncpa [#allocation3], 1 }
 0x3c5   :  { %542 = vsyncpa [#allocation6], 1 }
 0x3c6   :  { %543 = vsyncpa [#allocation4], 1 }
 0x3c7   :  { %544 = vsyncpa [#allocation10], 1 }

</bundles_post_ra>
